<compile_context>
chip_gen: v7x
topology: tpu7x:2x2x1
jax: 0.10.0
libtpu: 0.0.40
codegen_flags: <defaults>
</compile_context>

<pallas_src>
import jax
import jax.numpy as jnp
import numpy as np
from jax.experimental import pallas as pl
from jax.experimental.pallas import tpu as pltpu


# ---------------------------------------------------------------------------
# Pass 0: LayerNorm prologue (memory-bound), writes x_n in bf16 to HBM.
# ---------------------------------------------------------------------------
def _layernorm_kernel(x_ref, g_ref, b_ref, xn_ref):
    x = x_ref[...].astype(jnp.float32)
    mean = jnp.mean(x, axis=-1, keepdims=True)
    cent = x - mean
    var = jnp.mean(cent * cent, axis=-1, keepdims=True)
    xn = cent * jax.lax.rsqrt(var + 1e-5)
    xn_ref[...] = (xn * g_ref[...] + b_ref[...]).astype(jnp.bfloat16)


# ---------------------------------------------------------------------------
# Pass 1: binarized GEMM  y = x_n @ sign(W)^T + b, plus per-row-panel |y| max.
# ---------------------------------------------------------------------------
def _bitlinear_gemm_kernel(xn_ref, w_ref, b_ref, y_ref, max_ref):
    j = pl.program_id(1)
    k = pl.program_id(2)
    nk = pl.num_programs(2)
    tk = w_ref.shape[0]

    @pl.when(jnp.logical_and(j == 0, k == 0))
    def _():
        max_ref[...] = jnp.zeros_like(max_ref)        # |y| >= 0, so 0 is a safe init

    @pl.when(k == 0)
    def _():
        # y's block index (i, j) is constant across k -> legal resident
        # accumulator; seed it with the bias so no extra scratch is needed.
        y_ref[...] = jnp.broadcast_to(b_ref[...], y_ref.shape)

    col = pl.multiple_of(k * tk, tk)
    a = xn_ref[:, pl.ds(col, tk)]                     # (tm, tk) bf16
    w = w_ref[...].astype(jnp.bfloat16)               # int8 -> bf16 (exact {-1,0,+1})
    y_ref[...] += jnp.dot(a, w, preferred_element_type=jnp.float32)

    @pl.when(k == nk - 1)
    def _():
        # Fold this (i, j) tile's abs-max into the per-row-panel max block,
        # which is resident across j and k (index map (i, 0)).
        max_ref[...] = jnp.maximum(max_ref[...], jnp.max(jnp.abs(y_ref[...])))


# ---------------------------------------------------------------------------
# Pass 2: global-scale absmax quantization (lane-dense, memory-bound).
# ---------------------------------------------------------------------------
def _quantize_kernel(params_ref, y_ref, q_ref, dq_ref):
    scale = params_ref[0]       # 127 / global abs-max
    dq_mult = params_ref[1]     # (abs_max / 127) * ||W||_F * sqrt(dim)
    q = jnp.round(y_ref[...] * scale)
    q_ref[...] = q.astype(jnp.int8)
    dq_ref[...] = (q * dq_mult).astype(dq_ref.dtype)


# ---------------------------------------------------------------------------
# Helpers
# ---------------------------------------------------------------------------
def _pick_tile(extent, preferred, unit):
    if extent % unit != 0:
        return extent                      # full-extent block is always legal
    t = min(preferred, extent)
    t = max((t // unit) * unit, unit)
    while extent % t:
        t -= unit
    return t


def _vmem_limit_bytes():
    """VMEM limit derived from the actual chip (64 MiB/TC on v7x, 128 MiB on
    v5e/v6e), with headroom left for Mosaic-internal scratch."""
    cap = 64 * 1024 * 1024                 # conservative fallback (v7x per-TC)
    try:
        info = pltpu.get_tpu_info()
        cap = int(getattr(info, "vmem_capacity_bytes", cap))
    except Exception:
        pass
    return int(min(cap * 0.82, 100 * 1024 * 1024))


def prepare_bitlinear_params(weight, bias, gamma, beta):
    """One-time (weight-load time) preprocessing — keep out of the hot path."""
    w32 = weight.astype(jnp.float32)                       # torch layout (out, in)
    w_sign_t = jnp.sign(w32).T.astype(jnp.int8)            # (in, out); int8 halves HBM
    w_fro = jnp.sqrt(jnp.sum(w32 * w32))                   # ||W||_F
    b2 = bias.reshape(1, -1).astype(jnp.float32)
    g2 = gamma.reshape(1, -1).astype(jnp.float32)
    be2 = beta.reshape(1, -1).astype(jnp.float32)
    return w_sign_t, b2, g2, be2, w_fro


def bitlinear(x, w_sign_t, bias2, gamma2, beta2, w_fro, *,
              tm=None, tn=None, tk=None, tm_ln=None, tm2=None, tn2=None,
              dq_dtype=jnp.float32):
    """x: (N, dim_in) float; w_sign_t: (dim_in, dim_out) int8 sign(W)^T;
    bias2/gamma2/beta2: (1, dim); w_fro: scalar ||W||_F."""
    n, dim_in = x.shape
    dim_out = w_sign_t.shape[1]

    vmem_limit = _vmem_limit_bytes()
    budget = int(vmem_limit * 0.85)        # per-pass staging budget

    # --- tile selection ------------------------------------------------------
    tn = tn or _pick_tile(dim_out, 512, 128)
    tk = tk or _pick_tile(dim_in, 512, 128)
    if tm is None:
        # Weight HBM traffic ~ (N/tm) * |W|: grow tm toward the MXU roofline,
        # bounded by the VMEM budget (dominant terms: double-buffered bf16 x_n
        # panel + double-buffered f32 y block + double-buffered int8 W tile).
        per_row = 2 * dim_in * 2 + 2 * tn * 4
        fixed = 2 * tk * tn + 2 * 8 * tn * 4 + 2 * 8 * 128 * 4
        cap_rows = max(16, (budget - fixed) // per_row)
        tm = _pick_tile(n, min(1024, int(cap_rows)), 16)   # 16: bf16 sublane packing
    if tm_ln is None:
        per_row = 2 * dim_in * 4 + 2 * dim_in * 2          # f32 in + bf16 out, 2-buffered
        cap_rows = max(16, (budget - 4 * 8 * dim_in * 4) // per_row)
        tm_ln = _pick_tile(n, min(512, int(cap_rows)), 16)
    tm2 = tm2 or _pick_tile(n, 256, 32)                    # 32: int8 sublane packing
    tn2 = tn2 or _pick_tile(dim_out, 2048, 128)            # lane-dense stores

    assert n % tm == 0 and n % tm_ln == 0 and n % tm2 == 0
    assert dim_out % tn == 0 and dim_in % tk == 0 and dim_out % tn2 == 0

    ni, nj, nk = n // tm, dim_out // tn, dim_in // tk

    # --- Pass 0: LayerNorm -> bf16 x_n ----------------------------------------
    xn = pl.pallas_call(
        _layernorm_kernel,
        out_shape=jax.ShapeDtypeStruct((n, dim_in), jnp.bfloat16),
        grid_spec=pltpu.PrefetchScalarGridSpec(
            num_scalar_prefetch=0,
            grid=(n // tm_ln,),
            in_specs=[
                pl.BlockSpec((tm_ln, dim_in), lambda i: (i, 0)),
                pl.BlockSpec((1, dim_in), lambda i: (0, 0)),
                pl.BlockSpec((1, dim_in), lambda i: (0, 0)),
            ],
            out_specs=pl.BlockSpec((tm_ln, dim_in), lambda i: (i, 0)),
        ),
        compiler_params=pltpu.CompilerParams(
            dimension_semantics=("parallel",),
            vmem_limit_bytes=vmem_limit,
        ),
    )(x, gamma2, beta2)

    # --- Pass 1: binarized GEMM + per-panel |y| max ----------------------------
    # TODO(synk): pipeline_mode=pl.Buffered(1) on the x_n panel (its block index
    # is constant across j, k) would halve its staging; left at the default
    # depth for portability — the VMEM budget above already accounts for it.
    y, panel_max = pl.pallas_call(
        _bitlinear_gemm_kernel,
        out_shape=(
            jax.ShapeDtypeStruct((n, dim_out), jnp.float32),
            jax.ShapeDtypeStruct((ni * 8, 128), jnp.float32),
        ),
        grid_spec=pltpu.PrefetchScalarGridSpec(
            num_scalar_prefetch=0,
            grid=(ni, nj, nk),
            in_specs=[
                pl.BlockSpec((tm, dim_in), lambda i, j, k: (i, 0)),   # bf16 x_n panel
                pl.BlockSpec((tk, tn), lambda i, j, k: (k, j)),       # int8 sign(W)^T
                pl.BlockSpec((1, tn), lambda i, j, k: (0, j)),        # bias
            ],
            out_specs=(
                pl.BlockSpec((tm, tn), lambda i, j, k: (i, j)),       # y (resident over k)
                pl.BlockSpec((8, 128), lambda i, j, k: (i, 0)),       # |y| max (over j, k)
            ),
        ),
        compiler_params=pltpu.CompilerParams(
            dimension_semantics=("parallel", "arbitrary", "arbitrary"),
            vmem_limit_bytes=vmem_limit,
        ),
    )(xn, w_sign_t, bias2)

    # Tiny reduction of per-panel maxima -> exact global abs-max scale.
    abs_max = jnp.max(panel_max)
    scale = 127.0 / abs_max
    dq_mult = (abs_max / 127.0) * w_fro * (float(dim_in) ** 0.5)
    params = jnp.stack([scale, dq_mult]).astype(jnp.float32)          # (2,) SMEM scalars

    # --- Pass 2: global-scale quantize -----------------------------------------
    quant, dequant = pl.pallas_call(
        _quantize_kernel,
        out_shape=(
            jax.ShapeDtypeStruct((n, dim_out), jnp.int8),
            jax.ShapeDtypeStruct((n, dim_out), dq_dtype),
        ),
        grid_spec=pltpu.PrefetchScalarGridSpec(
            num_scalar_prefetch=0,
            grid=(n // tm2, dim_out // tn2),
            in_specs=[
                pl.BlockSpec(memory_space=pltpu.MemorySpace.SMEM),    # [scale, dq_mult]
                pl.BlockSpec((tm2, tn2), lambda i, j: (i, j)),
            ],
            out_specs=(
                pl.BlockSpec((tm2, tn2), lambda i, j: (i, j)),
                pl.BlockSpec((tm2, tn2), lambda i, j: (i, j)),
            ),
        ),
        compiler_params=pltpu.CompilerParams(
            dimension_semantics=("parallel", "parallel"),
            vmem_limit_bytes=vmem_limit,
        ),
    )(params, y)

    return quant, dequant


def _reference(x, weight, bias, gamma, beta):
    """Pure-JAX (f32) reference mirroring the torch module."""
    eps = 1e-5
    mean = jnp.mean(x, axis=-1, keepdims=True)
    var = jnp.mean((x - mean) ** 2, axis=-1, keepdims=True)
    xn = (x - mean) / jnp.sqrt(var + eps) * gamma + beta
    y = xn @ jnp.sign(weight).T + bias
    scale = 127.0 / jnp.max(jnp.abs(y))
    q = jnp.round(scale * y)
    dq = q / scale
    dq = dq * jnp.sqrt(jnp.sum(weight * weight)) / (x.shape[-1] ** (-0.5))
    return q.astype(jnp.int8), dq


if __name__ == "__main__":
    N, DIM = 64, 256

    key = jax.random.PRNGKey(0)
    kx, kw, kb = jax.random.split(key, 3)

    x = jax.random.normal(kx, (N, DIM), dtype=jnp.float32)

    # Deterministic parameter init mirroring nn.Linear / nn.LayerNorm defaults.
    bound = 1.0 / np.sqrt(DIM)
    weight = jax.random.uniform(kw, (DIM, DIM), jnp.float32, -bound, bound)  # (out, in)
    bias = jax.random.uniform(kb, (DIM,), jnp.float32, -bound, bound)
    gamma = jnp.ones((DIM,), jnp.float32)
    beta = jnp.zeros((DIM,), jnp.float32)

    # One-time weight preprocessing (int8 sign(W)^T, ||W||_F, row params).
    w_sign_t, b2, g2, be2, w_fro = prepare_bitlinear_params(weight, bias, gamma, beta)

    q_ref, dq_ref = _reference(x, weight, bias, gamma, beta)

    def check(quant, dequant):
        assert quant.dtype == jnp.int8 and dequant.dtype == jnp.float32
        # bf16 MXU operands can move q by at most +-1 vs the f32 reference.
        q_diff = np.max(np.abs(np.asarray(quant, np.int32) - np.asarray(q_ref, np.int32)))
        assert q_diff <= 1, q_diff
        step = float(np.max(np.abs(np.asarray(dq_ref)))) / 127.0   # one quant step in dq units
        assert np.allclose(np.asarray(dequant), np.asarray(dq_ref),
                           rtol=5e-3, atol=2.0 * step)

    # Small explicit tiles so every grid axis is exercised:
    #   LN grid (2,), GEMM grid (2, 2, 2), quantize grid (2, 1).
    quant, dequant = bitlinear(x, w_sign_t, b2, g2, be2, w_fro,
                               tm=32, tn=128, tk=128, tm_ln=32, tm2=32, tn2=256)
    jax.block_until_ready((quant, dequant))
    check(quant, dequant)

    # Default (VMEM-budget-derived) tiles.
    quant_d, dequant_d = bitlinear(x, w_sign_t, b2, g2, be2, w_fro)
    jax.block_until_ready((quant_d, dequant_d))
    check(quant_d, dequant_d)

    print("KERNEL_OK")
</pallas_src>

<mosaic_0001>
module attributes {stable_mosaic.version = 11 : i64} {
  func.func @_layernorm_kernel(%arg0: i32, %arg1: memref<32x256xf32, #tpu.memory_space<vmem>>, %arg2: memref<1x256xf32, #tpu.memory_space<vmem>>, %arg3: memref<1x256xf32, #tpu.memory_space<vmem>>, %arg4: memref<32x256xbf16, #tpu.memory_space<vmem>>) attributes {dimension_semantics = [#tpu.dimension_semantics<parallel>], iteration_bounds = array<i64: 2>, scalar_prefetch = 0 : i64, scratch_operands = 0 : i64, tpu.core_type = #tpu.core_type<tc>, window_params = [{transform_indices = @transform_0, window_bounds = array<i64: 32, 256>}, {pipeline_mode = #tpu.pipeline_mode<synchronous>, transform_indices = @transform_1, window_bounds = array<i64: 1, 256>}, {pipeline_mode = #tpu.pipeline_mode<synchronous>, transform_indices = @transform_2, window_bounds = array<i64: 1, 256>}, {transform_indices = @transform_3, window_bounds = array<i64: 32, 256>}]} {
    %c0 = arith.constant 0 : index
    %c0_0 = arith.constant 0 : index
    %0 = vector.load %arg1[%c0, %c0_0] : memref<32x256xf32, #tpu.memory_space<vmem>>, vector<32x256xf32>
    %cst = arith.constant dense<0.000000e+00> : vector<32xf32>
    %1 = vector.multi_reduction <add>, %0, %cst [1] : vector<32x256xf32> to vector<32xf32>
    %2 = vector.shape_cast %1 : vector<32xf32> to vector<32x1xf32>
    %cst_1 = arith.constant 2.560000e+02 : f32
    %3 = vector.broadcast %cst_1 : f32 to vector<32x1xf32>
    %4 = arith.divf %2, %3 : vector<32x1xf32>
    %5 = vector.broadcast %4 : vector<32x1xf32> to vector<32x256xf32>
    %6 = arith.subf %0, %5 : vector<32x256xf32>
    %7 = arith.mulf %6, %6 : vector<32x256xf32>
    %cst_2 = arith.constant dense<0.000000e+00> : vector<32xf32>
    %8 = vector.multi_reduction <add>, %7, %cst_2 [1] : vector<32x256xf32> to vector<32xf32>
    %9 = vector.shape_cast %8 : vector<32xf32> to vector<32x1xf32>
    %cst_3 = arith.constant 2.560000e+02 : f32
    %10 = vector.broadcast %cst_3 : f32 to vector<32x1xf32>
    %11 = arith.divf %9, %10 : vector<32x1xf32>
    %cst_4 = arith.constant 9.99999974E-6 : f32
    %12 = vector.broadcast %cst_4 : f32 to vector<32x1xf32>
    %13 = arith.addf %11, %12 : vector<32x1xf32>
    %14 = math.rsqrt %13 : vector<32x1xf32>
    %15 = vector.broadcast %14 : vector<32x1xf32> to vector<32x256xf32>
    %16 = arith.mulf %6, %15 : vector<32x256xf32>
    %c0_5 = arith.constant 0 : index
    %c0_6 = arith.constant 0 : index
    %17 = vector.load %arg2[%c0_5, %c0_6] : memref<1x256xf32, #tpu.memory_space<vmem>>, vector<1x256xf32>
    %18 = vector.broadcast %17 : vector<1x256xf32> to vector<32x256xf32>
    %19 = arith.mulf %16, %18 : vector<32x256xf32>
    %c0_7 = arith.constant 0 : index
    %c0_8 = arith.constant 0 : index
    %20 = vector.load %arg3[%c0_7, %c0_8] : memref<1x256xf32, #tpu.memory_space<vmem>>, vector<1x256xf32>
    %21 = vector.broadcast %20 : vector<1x256xf32> to vector<32x256xf32>
    %22 = arith.addf %19, %21 : vector<32x256xf32>
    %23 = arith.truncf %22 : vector<32x256xf32> to vector<32x256xbf16>
    %c0_9 = arith.constant 0 : index
    %c0_10 = arith.constant 0 : index
    %24 = vector.load %arg4[%c0_9, %c0_10] : memref<32x256xbf16, #tpu.memory_space<vmem>>, vector<32x256xbf16>
    tpu.vector_store %arg4[%c0_9, %c0_10], %23 {strides = array<i32>} : memref<32x256xbf16, #tpu.memory_space<vmem>>, vector<32x256xbf16>,
    return
  }
  func.func @transform_0(%arg0: i32) -> (i32, i32) {
    %c0_i32 = arith.constant 0 : i32
    %c0_i32_0 = arith.constant 0 : i32
    return %arg0, %c0_i32 : i32, i32
  }
  func.func @transform_1(%arg0: i32) -> (i32, i32) {
    %c0_i32 = arith.constant 0 : i32
    %c0_i32_0 = arith.constant 0 : i32
    %c0_i32_1 = arith.constant 0 : i32
    return %c0_i32, %c0_i32_0 : i32, i32
  }
  func.func @transform_2(%arg0: i32) -> (i32, i32) {
    %c0_i32 = arith.constant 0 : i32
    %c0_i32_0 = arith.constant 0 : i32
    %c0_i32_1 = arith.constant 0 : i32
    return %c0_i32, %c0_i32_0 : i32, i32
  }
  func.func @transform_3(%arg0: i32) -> (i32, i32) {
    %c0_i32 = arith.constant 0 : i32
    %c0_i32_0 = arith.constant 0 : i32
    return %arg0, %c0_i32 : i32, i32
  }
}

</mosaic_0001>

<bundles_post_ra>
// kernel: tpu_custom_call.1
= control target key start
LH: loop header
LB: loop body
LE: loop exit
PB: predicated region body
PF: predicated region fallthrough
CT: control target
= control target key end

     0   :  { %8 = vsyncpa [#allocation3], 0  ;;  %s820_s0 = inlined_call_operand.hbm [shape: f32[64,256], index: 0, kind: input, shape index: {}]   ;;  %s821_s1 = inlined_call_operand.vmem [shape: f32[1,256], index: 1, kind: input, shape index: {}]   ;;  %s822_s2 = inlined_call_operand.vmem [shape: f32[1,256], index: 2, kind: input, shape index: {}]   ;;  %s823_s3 = inlined_call_operand.hbm [shape: bf16[64,256], index: 3, kind: output, shape index: {}]  }
   0x1   :  { %10 = vsyncpa [#allocation3 + $0x1], 0 }
   0x2   :  { %11 = vsyncpa [#allocation4], 0 }
   0x3   :  { %13 = vsyncpa [#allocation4 + $0x1], 0  ;;  %s631_s12 = smov 0   ;;  %s633_s13 = smov 0  }
   0x4   :  { %s635_s14 = smov 0   ;;  %s637_s15 = smov 0  }
   0x5 LB: > { %s652_s16 = sadd.s32 4294967295, %s603_s15   ;;  %s421_s17 = sadd.s32 4294967294, %s603_s15   ;;  %s603_s15 = sphi %s637_s15, %s836_s15   ;;  %s599_s14 = sphi %s635_s14, %s835_s14   ;;  %s595_s13 = sphi %s633_s13, %s834_s13   ;;  %s591_s12 = sphi %s631_s12, %s833_s12  }
   0x6   : > { %s656_s18 = sadd.s32 1, %s603_s15   ;;  %s26_s19 = sadd.s32 1, %s599_s14 }
   0x7   : > { %s23_s20 = ssub.s32 %s603_s15, %s656_s18  ;;  %p33_p0 = scmp.ne.s32.totalorder %s599_s14, %s595_s13 }
   0x8   : > { %p24_p1 = scmp.eq.s32.totalorder %s23_s20, 0  ;;  %p34_p2 = scmp.eq.s32.totalorder %s603_s15, 0 }
   0x9   : > { %p39_p3 = scmp.ne.s32.totalorder %s595_s13, %s591_s12  ;;  %p40_p4 = scmp.eq.s32.totalorder %s652_s16, 0 }
   0xa   : > { %s668_s21 = scalar_select %p24_p1, %s599_s14, %s26_s19  }
   0xb   : > { %p670_p5 = por %p34_p2, %p33_p0  ;;  %p674_p6 = por %p40_p4, %p39_p3 }
   0xc   : > { %p105_p7 = scmp.eq.s32.totalorder %s652_s16, 1  ;;  %p111_p8 = scmp.eq.s32.totalorder %s421_s17, 1 }
   0xd   : > { %p461_p10 = scmp.lt.s32.totalorder %s603_s15, 2  ;;  %s137_s26 = sand.u32 1, %s599_s14  }
   0xe   : > { %p681_p11 = por %p105_p7, %p33_p0  ;;  %p685_p12 = por %p111_p8, %p39_p3 }
   0xf   : > { %s442_s27 = sshll.u32 %s603_s15, 10  ;;  %s424_s28 = sshll.u32 %s137_s26, 6 }
  0x10   : > { %s827_s24 = scalar_select %p681_p11, 1, 0 }
  0x11   : > { %s828_s25 = scalar_select %p685_p12, 1, 0 }
  0x12   : > { %s694_s4 = scalar_lea.hbm %s820_s0, %s442_s27  ;;  %s141_s5 = scalar_lea.vmem [#allocation2], %s424_s28 }
  0x13   : > { %s149_s6 = sshll.u32 %s141_s5, 4  ;;  %p698_p13 = pnand %p461_p10, %p670_p5  ;;  %s702_s6 = int_to_ptr.vmem [resolvable:$true] %s149_s6 }
  0x14   : > { %s704_s8 = scalar_lea.sflag [#allocation3], %s137_s26  ;;  %s507_s9 = scalar_lea.hbm %s694_s4, 1024 }
  0x15   : > { %p508_p0 = scmp.ne.s32.totalorder %s694_s4, %s507_s9  ;;  %p509_p1 = pneg %p698_p13 }
  0x16   : > { %s512_s17 = scalar_lea.hbm %s820_s0, 2048  ;;  %p513_p4 = scmp.lt.u32.totalorder %s694_s4, %s820_s0 }
  0x17   : > { %p510_p2 = pnand %p509_p1, %p508_p0  ;;  %p514_p5 = scmp.lt.u32.totalorder %s512_s17, %s507_s9 }
  0x18   : > { %p516_p8 = scmp.lt.u32.totalorder %s507_s9, %s694_s4 }
  0x19   : > { %p511_p3 = pneg %p510_p2  ;;  %p515_p7 = por %p514_p5, %p513_p4 }
  0x1b   : > { %p517_p10 = por %p516_p8, %p515_p7 }
  0x1d   : > { %p518_p9 = pnand %p517_p10, %p511_p3 }
  0x1f   : > { %521 = shalt.err (!%p518_p9)
}
  0x20   : > { %s522_s22 = scalar_lea.vmem %s702_s6, 1024  ;;  %s605_s26 = smov [#allocation2]  }
  0x21   : > { %p523_p0 = scmp.ne.s32.totalorder %s702_s6, %s522_s22  ;;  %s527_s27 = sshll.u32 %s605_s26, 4  ;;  %s528_s27 = int_to_ptr.vmem [resolvable:$false] %s527_s27 }
  0x22   : > { %s529_s28 = scalar_lea.vmem %s528_s27, 2048  ;;  %p530_p11 = scmp.lt.s32.totalorder %s702_s6, %s528_s27 }
  0x23   : > { %p525_p2 = pnand %p523_p0, %p509_p1  ;;  %p531_p4 = scmp.lt.s32.totalorder %s529_s28, %s522_s22 }
  0x25   : > { %p526_p12 = pneg %p525_p2  ;;  %p532_p5 = por %p531_p4, %p530_p11 }
  0x27   : > { %p533_p7 = pnand %p532_p5, %p526_p12 }
  0x29   : > { %536 = shalt.err (!%p533_p7)
}
  0x2a   : > { %s606_s29 = smov 256   ;;  %s607_s30 = smov 16  }
  0x2b   : > { %456 = dma.hbm_to_vmem [thread:$0]  (!%p698_p13), %s694_s4, 1024, %s702_s6, %s704_s8, %s606_s29, %s606_s29, %s607_s30  }
  0x2c   : > { %p428_p9 = scmp.ge.s32.totalorder %s603_s15, 1  ;;  %p157_p1 = scmp.lt.s32.totalorder %s603_s15, 3 }
  0x2e   : > { %p158_p3 = pnand %p428_p9, %p157_p1 }
  0x2f   : > { %s735_s5 = sand.u32 (!%p158_p3), 1, %s595_s13  }
  0x30   : > { %161 = sbr.rel (%p158_p3) target bundleno = 397 (0x18d), region = 32  ;;  %s429_s9 = sshll.u32 (!%p158_p3), %s735_s5, 6 }
  0x31   : > { %s164_s10 = scalar_lea.sflag (!%p158_p3), [#allocation3], %s735_s5  ;;  %s167_s11 = scalar_lea.vmem (!%p158_p3), [#allocation2], %s429_s9 }
  0x37   : > { %582 = dma.done.wait (%p674_p6), %s164_s10, 1024  }
  0x38   : > { %584 = vsyncadd (%p674_p6), %s164_s10, 4294966272  ;;  %v192_v0 = vld [vmem:[%s167_s11] sm:$0xff]  ;;  %v193_v1 = vld [vmem:[%s167_s11 + $0x8] sm:$0xff]  ;;  %v267_v42 = vlaneseq  ;;  %s430_s8 = sshll.u32 %s735_s5, 5  ;;  %s448_s19 = sshll.u32 %s652_s16, 9 }
  0x39   : > { %v196_v2 = vld [vmem:[%s167_s11 + $0x20] sm:$0xff]  ;;  %v200_v3 = vadd.f32 %v193_v1, %v192_v0  ;;  %v197_v4 = vld [vmem:[%s167_s11 + $0x28] sm:$0xff]  ;;  %v194_v5 = vld [vmem:[%s167_s11 + $0x10] sm:$0xff]  ;;  %s189_s17 = scalar_lea.vmem [#allocation5], %s430_s8  ;;  %s774_s27 = scalar_lea.hbm %s823_s3, %s448_s19 }
  0x3a   : > { %v195_v6 = vld [vmem:[%s167_s11 + $0x18] sm:$0xff]  ;;  %v206_v7 = vadd.f32 %v197_v4, %v196_v2  ;;  %v198_v8 = vld [vmem:[%s167_s11 + $0x30] sm:$0xff]  ;;  %v268_v48 = vshrl.u32 %v267_v42, 7  ;;  %v265_v55 = vld [vmem:[%s821_s1] sm:$0x3]  ;;  %s348_s20 = sshll.u32 %s189_s17, 4  ;;  %s776_s20 = int_to_ptr.vmem [resolvable:$true] %s348_s20 }
  0x3b   : > { %v199_v9 = vld [vmem:[%s167_s11 + $0x38] sm:$0xff]  ;;  %201 = vadd.xlane.f32.xlu0 %v200_v3  ;;  %v203_v10 = vadd.f32 %v195_v6, %v194_v5  ;;  %v285_v57 = vld [vmem:[%s822_s2] sm:$0x3]  ;;  %s334_s28 = scalar_lea.sflag [#allocation4], %s735_s5  ;;  %s537_s16 = scalar_lea.vmem %s776_s20, 512 }
  0x3c   : > { %207 = vadd.xlane.f32.xlu1 %v206_v7  ;;  %v209_v11 = vadd.f32 %v199_v9, %v198_v8  ;;  %v269_v53 = vsub.s32 0, %v268_v48  ;;  %v273_v54 = vsub.s32 1, %v268_v48  ;;  %p538_p6 = scmp.ne.s32.totalorder %s776_s20, %s537_s16  ;;  %p830_p11 = scmp.ne.s32.totalorder %s827_s24, 0 }
  0x3d   : > { %s608_s29 = smov [#allocation5]  }
  0x3e   : > { %v270_v58 = vrot.slane %v265_v55, %v269_v53  ;;  %v274_v59 = vrot.slane %v265_v55, %v273_v54  ;;  %v290_v61 = vrot.slane %v285_v57, %v269_v53  ;;  %v294_v62 = vrot.slane %v285_v57, %v273_v54  ;;  %p539_p12 = pnand %p538_p6, %p830_p11  ;;  %s541_s30 = sshll.u32 %s608_s29, 4  ;;  %s542_s30 = int_to_ptr.vmem [resolvable:$false] %s541_s30 }
  0x3f   : > { %204 = vadd.xlane.f32.xlu0 %v203_v10  ;;  %s543_s9 = scalar_lea.vmem %s542_s30, 1024  ;;  %p544_p8 = scmp.lt.s32.totalorder %s776_s20, %s542_s30 }
  0x40   : > { %210 = vadd.xlane.f32.xlu1 %v209_v11  ;;  %p540_p13 = pneg %p539_p12  ;;  %p545_p10 = scmp.lt.s32.totalorder %s543_s9, %s537_s16 }
  0x42   : > { %p546_p0 = por %p545_p10, %p544_p8 }
  0x44   : > { %p547_p2 = pnand %p546_p0, %p540_p13 }
  0xc8   : > { %v202_v12 = vpop.xlane.xlu0 %201 }
  0xc9   : > { %v213_v13 = vmul.f32 0.00390625, %v202_v12  ;;  %v208_v14 = vpop.xlane.xlu1 %207 }
  0xca   : > { %v215_v15 = vmul.f32 0.00390625, %v208_v14 }
  0xcb   : > { %v217_v16 = vsub.f32 %v192_v0, %v213_v13  ;;  %v218_v17 = vsub.f32 %v193_v1, %v213_v13 }
  0xcc   : > { %v743_v18 = vsub.f32 %v196_v2, %v215_v15  ;;  %v745_v19 = vsub.f32 %v197_v4, %v215_v15  ;;  %v205_v20 = vpop.xlane.xlu0 %204 }
  0xcd   : > { %v214_v21 = vmul.f32 0.00390625, %v205_v20  ;;  %v211_v22 = vpop.xlane.xlu1 %210  ;;  %v225_v23 = vmul.f32 %v217_v16, %v217_v16  ;;  %v226_v24 = vmul.f32 %v218_v17, %v218_v17 }
  0xce   : > { %v216_v25 = vmul.f32 0.00390625, %v211_v22  ;;  %v229_v26 = vmul.f32 %v743_v18, %v743_v18  ;;  %v230_v27 = vmul.f32 %v745_v19, %v745_v19 }
  0xcf   : > { %v219_v28 = vsub.f32 %v194_v5, %v214_v21  ;;  %v220_v29 = vsub.f32 %v195_v6, %v214_v21  ;;  %v233_v30 = vadd.f32 %v226_v24, %v225_v23 }
  0xd0   : > { %v751_v31 = vsub.f32 %v198_v8, %v216_v25  ;;  %v753_v32 = vsub.f32 %v199_v9, %v216_v25  ;;  %v239_v33 = vadd.f32 %v230_v27, %v229_v26 }
  0xd1   : > { %234 = vadd.xlane.f32.xlu0 %v233_v30  ;;  %v227_v34 = vmul.f32 %v219_v28, %v219_v28  ;;  %v228_v35 = vmul.f32 %v220_v29, %v220_v29 }
  0xd2   : > { %v231_v36 = vmul.f32 %v751_v31, %v751_v31  ;;  %v232_v37 = vmul.f32 %v753_v32, %v753_v32 }
  0xd3   : > { %v236_v38 = vadd.f32 %v228_v35, %v227_v34 }
  0xd4   : > { %v242_v39 = vadd.f32 %v232_v37, %v231_v36 }
  0xd5   : > { %240 = vadd.xlane.f32.xlu0 %v239_v33  ;;  %237 = vadd.xlane.f32.xlu1 %v236_v38 }
  0xd9   : > { %243 = vadd.xlane.f32.xlu1 %v242_v39 }
 0x15e   : > { %v235_v40 = vpop.xlane.xlu0 %234 }
 0x15f   : > { %v245_v41 = vmul.f32 0.00390625, %v235_v40 }
 0x161   : > { %v249_v43 = vadd.f32 1e-05, %v245_v41 }
 0x162   : > { %v238_v44 = vpop.xlane.xlu1 %237  ;;  %v241_v45 = vpop.xlane.xlu0 %240 }
 0x163   : > { %499 = vrsqrt.f32 %v249_v43  ;;  %v246_v46 = vmul.f32 0.00390625, %v238_v44  ;;  %v247_v47 = vmul.f32 0.00390625, %v241_v45 }
 0x165   : > { %v250_v49 = vadd.f32 1e-05, %v246_v46  ;;  %v251_v50 = vadd.f32 1e-05, %v247_v47 }
 0x166   : > { %v244_v51 = vpop.xlane.xlu1 %243 }
 0x167   : > { %501 = vrsqrt.f32 %v250_v49  ;;  %v248_v52 = vmul.f32 0.00390625, %v244_v51 }
 0x168   : > { %503 = vrsqrt.f32 %v251_v50 }
 0x169   : > { %v252_v56 = vadd.f32 1e-05, %v248_v52 }
 0x16b   : > { %505 = vrsqrt.f32 %v252_v56 }
 0x16d   : > { %v500_v60 = vpop.eup %499 }
 0x16e   : > { %v257_v63 = vmul.f32 %v500_v60, %v217_v16  ;;  %v258_v0 = vmul.f32 %v500_v60, %v218_v17 }
 0x170   : > { %v277_v1 = vmul.f32 %v270_v58, %v257_v63  ;;  %v278_v2 = vmul.f32 %v274_v59, %v258_v0 }
 0x171   : > { %v502_v3 = vpop.eup %501 }
 0x172   : > { %v504_v4 = vpop.eup %503  ;;  %v297_v5 = vadd.f32 %v290_v61, %v277_v1  ;;  %v298_v6 = vadd.f32 %v294_v62, %v278_v2  ;;  %v259_v7 = vmul.f32 %v502_v3, %v219_v28  ;;  %v260_v8 = vmul.f32 %v502_v3, %v220_v29 }
 0x173   : > { %v261_v9 = vmul.f32 %v504_v4, %v743_v18  ;;  %v262_v10 = vmul.f32 %v504_v4, %v745_v19 }
 0x174   : > { %v443_v11 = vpack.c.bf16 %v298_v6, %v297_v5  ;;  %v279_v12 = vmul.f32 %v270_v58, %v259_v7  ;;  %v280_v13 = vmul.f32 %v274_v59, %v260_v8 }
 0x175   : > { %v506_v14 = vpop.eup %505  ;;  %v281_v15 = vmul.f32 %v270_v58, %v261_v9  ;;  %v282_v16 = vmul.f32 %v274_v59, %v262_v10 }
 0x176   : > { %329 = vst [vmem:[%s189_s17] sm:$0xff] %v443_v11  ;;  %v299_v17 = vadd.f32 %v290_v61, %v279_v12  ;;  %v300_v20 = vadd.f32 %v294_v62, %v280_v13  ;;  %v263_v21 = vmul.f32 %v506_v14, %v751_v31  ;;  %v264_v22 = vmul.f32 %v506_v14, %v753_v32 }
 0x177   : > { %v301_v23 = vadd.f32 %v290_v61, %v281_v15  ;;  %v302_v18 = vadd.f32 %v294_v62, %v282_v16 }
 0x178   : > { %v444_v24 = vpack.c.bf16 %v300_v20, %v299_v17  ;;  %v283_v19 = vmul.f32 %v270_v58, %v263_v21  ;;  %v284_v25 = vmul.f32 %v274_v59, %v264_v22 }
 0x179   : > { %v445_v26 = vpack.c.bf16 %v302_v18, %v301_v23 }
 0x17a   : > { %330 = vst [vmem:[%s189_s17 + $0x8] sm:$0xff] %v444_v24  ;;  %v303_v27 = vadd.f32 %v290_v61, %v283_v19  ;;  %v304_v28 = vadd.f32 %v294_v62, %v284_v25 }
 0x17b   : > { %331 = vst [vmem:[%s189_s17 + $0x10] sm:$0xff] %v445_v26 }
 0x17c   : > { %v446_v29 = vpack.c.bf16 %v304_v28, %v303_v27 }
 0x17e   : > { %332 = vst [vmem:[%s189_s17 + $0x18] sm:$0xff] %v446_v29 }
 0x17f   : > { %550 = shalt.err (!%p547_p2)
}
 0x180   : > { %s551_s10 = scalar_lea.hbm %s774_s27, 512  ;;  %s555_s4 = scalar_lea.hbm %s823_s3, 1024 }
 0x181   : > { %p552_p4 = scmp.ne.s32.totalorder %s774_s27, %s551_s10  ;;  %p556_p9 = scmp.lt.u32.totalorder %s774_s27, %s823_s3 }
 0x182   : > { %p557_p1 = scmp.lt.u32.totalorder %s555_s4, %s551_s10  ;;  %p559_p6 = scmp.lt.u32.totalorder %s551_s10, %s774_s27 }
 0x183   : > { %p553_p5 = pnand %p552_p4, %p830_p11 }
 0x184   : > { %p558_p3 = por %p557_p1, %p556_p9 }
 0x185   : > { %p554_p7 = pneg %p553_p5 }
 0x186   : > { %p560_p12 = por %p559_p6, %p558_p3 }
 0x188   : > { %p561_p13 = pnand %p560_p12, %p554_p7 }
 0x18a   : > { %564 = shalt.err (!%p561_p13)
}
 0x18b   : > { %s609_s8 = smov 128   ;;  %s610_s17 = smov 8  }
 0x18c   : > { %451 = dma.vmem_to_hbm [thread:$0]  (%p830_p11), %s776_s20, 512, %s774_s27, %s334_s28, %s609_s8, %s609_s8, %s610_s17  }
 0x18d PF: > { %s363_s19 = sand.u32 1, %s591_s12   ;;  %p831_p8 = scmp.ne.s32.totalorder %s828_s25, 0 }
 0x18e   : > { %p832_p10 = scmp.ge.s32.totalorder %s603_s15, 2  ;;  %s364_s22 = scalar_lea.sflag [#allocation4], %s363_s19 }
 0x190   : > { %p458_p0 = pnand %p832_p10, %p831_p8 }
 0x192   : > { %586 = dma.done.wait (!%p458_p0), %s364_s22, 512  }
 0x193   : > { %588 = vsyncadd (!%p458_p0), %s364_s22, 4294966784  ;;  %p16_p2 = scmp.ge.s32.totalorder %s656_s18, 4   ;;  %s833_s12 = smov %s595_s13 }
 0x194   : > { %s834_s13 = smov %s599_s14  ;;  %s835_s14 = smov %s668_s21 }
 0x195   : > { %s836_s15 = smov %s656_s18  ;;  %18 = sbr.rel (!%p16_p2) target bundleno = 5 (0x5), region = 77 }
 0x19c   :  { %369 = vsyncpa [#allocation3], 1 }
 0x19d   :  { %371 = vsyncpa [#allocation3 + $0x1], 1 }
 0x19e   :  { %372 = vsyncpa [#allocation4], 1 }
 0x19f   :  { %374 = vsyncpa [#allocation4 + $0x1], 1 }

</bundles_post_ra>
